<compile_context>
chip_gen: v6e
topology: v6e:2x2x1
jax: 0.10.0
libtpu: 0.0.40
codegen_flags: <defaults>
</compile_context>

<pallas_src>
import functools

import numpy as np
import jax
import jax.numpy as jnp
from jax.experimental import pallas as pl
from jax.experimental.pallas import tpu as pltpu

EPS = 1e-5                       # default eps for InstanceNorm2d and BatchNorm2d
VMEM_LIMIT = 32 * 1024 * 1024    # safe on v5e/v6e (128 MiB phys) and v7x (64 MiB)


# ----------------------------- kernels ---------------------------------------
def _stats1_kernel(x_ref, w1_ref, sum_ref, sq_ref):
    """Accumulate per-(sample, channel) sum / sum-of-squares of h1 = W1 @ x."""
    h1 = jnp.dot(w1_ref[...], x_ref[...], preferred_element_type=jnp.float32)

    @pl.when(pl.program_id(1) == 0)
    def _init():
        sum_ref[...] = jnp.zeros_like(sum_ref)
        sq_ref[...] = jnp.zeros_like(sq_ref)

    sum_ref[...] += jnp.sum(h1, axis=-1, keepdims=True)
    sq_ref[...] += jnp.sum(h1 * h1, axis=-1, keepdims=True)


def _stats2_kernel(x_ref, w1_ref, w2_ref, c1_ref, sum_ref, sq_ref):
    """Accumulate per-(sample, channel) moments of h2 = W2 @ relu(IN+BN1(h1))."""
    h1 = jnp.dot(w1_ref[...], x_ref[...], preferred_element_type=jnp.float32)
    z1 = jnp.maximum(h1 * c1_ref[:, 0:1] + c1_ref[:, 1:2], 0.0)
    h2 = jnp.dot(w2_ref[...], z1.astype(jnp.bfloat16),
                 preferred_element_type=jnp.float32)

    @pl.when(pl.program_id(1) == 0)
    def _init():
        sum_ref[...] = jnp.zeros_like(sum_ref)
        sq_ref[...] = jnp.zeros_like(sq_ref)

    sum_ref[...] += jnp.sum(h2, axis=-1, keepdims=True)
    sq_ref[...] += jnp.sum(h2 * h2, axis=-1, keepdims=True)


def _out_kernel(*refs, pre):
    """out = relu(fused IN+BN2(h2) + right); right = Wr@x (bias folded) or x."""
    if pre:
        x_ref, w1_ref, w2_ref, c1_ref, c2_ref, wr_ref, o_ref = refs
    else:
        x_ref, w1_ref, w2_ref, c1_ref, c2_ref, o_ref = refs
        wr_ref = None

    x = x_ref[...]
    h1 = jnp.dot(w1_ref[...], x, preferred_element_type=jnp.float32)
    z1 = jnp.maximum(h1 * c1_ref[:, 0:1] + c1_ref[:, 1:2], 0.0)     # IN+BN1+ReLU
    h2 = jnp.dot(w2_ref[...], z1.astype(jnp.bfloat16),
                 preferred_element_type=jnp.float32)
    left = h2 * c2_ref[:, 0:1] + c2_ref[:, 1:2]                      # IN+BN2
    if pre:
        right = jnp.dot(wr_ref[...], x, preferred_element_type=jnp.float32)
    else:
        right = x.astype(jnp.float32)                                # Cin == Cout
    o_ref[...] = jnp.maximum(left + right, 0.0)


# ----------------------------- host-side glue --------------------------------
def _fused_coeffs(sums, sqs, count, gamma, beta):
    """(scale, shift), each (N, Cout): BN(IN(h))[n] == h[n] * scale[n] + shift[n].

    Training-mode BN with biased batch variance over (N,H,W), IN with biased
    variance, both eps=1e-5.  BN statistics of the IN output y = a*h + b are
    derived analytically from the tiny per-(n,c) first/second moments.
    """
    inv = 1.0 / count
    mean = sums * inv
    msq = sqs * inv
    var = jnp.maximum(msq - mean * mean, 0.0)
    a = jax.lax.rsqrt(var + EPS)                          # IN scale
    b = -mean * a                                         # IN shift
    y_mean = a * mean + b                                 # == 0 up to fp
    y_msq = a * a * msq + 2.0 * a * b * mean + b * b
    bn_mean = jnp.mean(y_mean, axis=0)                    # (Cout,)
    bn_var = jnp.maximum(jnp.mean(y_msq, axis=0) - bn_mean * bn_mean, 0.0)
    bn_scale = jax.lax.rsqrt(bn_var + EPS) * gamma
    scale = a * bn_scale[None, :]
    shift = (b - bn_mean[None, :]) * bn_scale[None, :] + beta[None, :]
    return scale, shift


def _pick_hw_tile(hw, cin, cout, budget_bytes=8 << 20):
    """Largest lane tile (multiple of 128 dividing HW) within a VMEM budget."""
    if hw % 128 != 0:
        return hw                        # odd spatial size: single full-width tile
    # Rough per-lane bytes: bf16 x + f32 out (double buffered) + ~4 f32 temps.
    per_lane = 2 * 2 * cin + (2 + 4) * 4 * cout
    max_t = max(128, (budget_bytes // per_lane) // 128 * 128)
    best = 128
    for t in range(128, min(hw, max_t) + 1, 128):
        if hw % t == 0:
            best = t
    return best


@functools.partial(jax.jit, static_argnames=("pre",))
def resnet_block(x_nchw, params, *, pre):
    """x_nchw: (N, Cin, H, W) float32 -> (N, Cout, H, W) float32."""
    N, Cin, H, W = x_nchw.shape
    Cout = params["wl1"].shape[0]
    HW = H * W
    if not pre and Cin != Cout:
        raise ValueError("pre=False requires inchannel == outchannel")

    T = _pick_hw_tile(HW, Cin, Cout)
    n_hw = HW // T

    # Free reshape of NCHW; bf16 feeds halve per-step VMEM and hit MXU native rate.
    x3d = x_nchw.reshape(N, Cin, HW).astype(jnp.bfloat16)
    w1 = params["wl1"].astype(jnp.bfloat16)
    w2 = params["wl2"].astype(jnp.bfloat16)

    x_spec = pl.BlockSpec((None, Cin, T), lambda n, h: (n, 0, h))
    w1_spec = pl.BlockSpec((Cout, Cin), lambda n, h: (0, 0))       # resident weight
    w2_spec = pl.BlockSpec((Cout, Cout), lambda n, h: (0, 0))      # resident weight
    coef_spec = pl.BlockSpec((None, Cout, 2), lambda n, h: (n, 0, 0))
    stat_spec = pl.BlockSpec((None, Cout, 1), lambda n, h: (n, 0, 0))
    stat_shape = jax.ShapeDtypeStruct((N, Cout, 1), jnp.float32)

    # hw axis reduces into the resident stats block -> keep it "arbitrary" & last.
    cp_red = pltpu.CompilerParams(dimension_semantics=("parallel", "arbitrary"),
                                  vmem_limit_bytes=VMEM_LIMIT)
    cp_par = pltpu.CompilerParams(dimension_semantics=("parallel", "parallel"),
                                  vmem_limit_bytes=VMEM_LIMIT)

    # --- call A: per-(n,c) moments of h1 -------------------------------------
    sum1, sq1 = pl.pallas_call(
        _stats1_kernel,
        out_shape=(stat_shape, stat_shape),
        grid=(N, n_hw),
        in_specs=[x_spec, w1_spec],
        out_specs=(stat_spec, stat_spec),
        compiler_params=cp_red,
    )(x3d, w1)

    s1, t1 = _fused_coeffs(sum1[..., 0], sq1[..., 0], HW,
                           params["g1"][:, 0], params["be1"][:, 0])
    coef1 = jnp.stack([s1, t1], axis=-1)                           # (N, Cout, 2) f32

    # --- call B: per-(n,c) moments of h2 -------------------------------------
    sum2, sq2 = pl.pallas_call(
        _stats2_kernel,
        out_shape=(stat_shape, stat_shape),
        grid=(N, n_hw),
        in_specs=[x_spec, w1_spec, w2_spec, coef_spec],
        out_specs=(stat_spec, stat_spec),
        compiler_params=cp_red,
    )(x3d, w1, w2, coef1)

    s2, t2 = _fused_coeffs(sum2[..., 0], sq2[..., 0], HW,
                           params["g2"][:, 0], params["be2"][:, 0])
    if pre:
        t2 = t2 + params["br"][:, 0][None, :]     # fold right-conv bias into shift
    coef2 = jnp.stack([s2, t2], axis=-1)

    # --- call C: final output tiles (written to HBM exactly once) ------------
    inputs = [x3d, w1, w2, coef1, coef2]
    in_specs = [x_spec, w1_spec, w2_spec, coef_spec, coef_spec]
    if pre:
        inputs.append(params["wr"].astype(jnp.bfloat16))
        in_specs.append(pl.BlockSpec((Cout, Cin), lambda n, h: (0, 0)))

    out3d = pl.pallas_call(
        functools.partial(_out_kernel, pre=pre),
        out_shape=jax.ShapeDtypeStruct((N, Cout, HW), jnp.float32),
        grid=(N, n_hw),
        in_specs=in_specs,
        out_specs=pl.BlockSpec((None, Cout, T), lambda n, h: (n, 0, h)),
        compiler_params=cp_par,
    )(*inputs)

    return out3d.reshape(N, Cout, H, W)


# ---------------- pure-JAX reference (NCHW, mirrors the PyTorch module) ------
def reference(x, p, *, pre, matmul_dtype=jnp.float32):
    """matmul_dtype=bfloat16 reproduces the kernel's MXU input rounding (all
    other math in f32) for a tight comparison; float32 is the exact module."""
    f32 = jnp.float32
    q = lambda a: a.astype(matmul_dtype).astype(f32)
    x = q(x)

    def conv1x1(v, w, b):
        return jnp.einsum("ncij,oc->noij", q(v), q(w),
                          precision=jax.lax.Precision.HIGHEST) \
               + b[None, :, None, None]

    def inorm(v):
        mu = v.mean(axis=(2, 3), keepdims=True)
        var = ((v - mu) ** 2).mean(axis=(2, 3), keepdims=True)
        return (v - mu) / jnp.sqrt(var + EPS)

    def bnorm(v, g, b):
        mu = v.mean(axis=(0, 2, 3), keepdims=True)
        var = ((v - mu) ** 2).mean(axis=(0, 2, 3), keepdims=True)
        return (v - mu) / jnp.sqrt(var + EPS) * g[None, :, None, None] \
               + b[None, :, None, None]

    # The reference KEEPS the left-branch conv biases (as PyTorch does); the
    # kernel drops them because InstanceNorm cancels per-channel constants.
    h = conv1x1(x, p["wl1"], p["bl1"][:, 0])
    h = bnorm(inorm(h), p["g1"][:, 0], p["be1"][:, 0])
    h = jnp.maximum(h, 0.0)
    h = conv1x1(h, p["wl2"], p["bl2"][:, 0])
    h = bnorm(inorm(h), p["g2"][:, 0], p["be2"][:, 0])
    x1 = conv1x1(x, p["wr"], p["br"][:, 0]) if pre else x
    return jnp.maximum(h + x1, 0.0)


def _check(out, x, p, *, pre):
    # Tight check against a reference sharing the kernel's bf16 matmul-input
    # rounding (validates the IN/BN fusion math), plus a looser sanity check
    # against the exact f32 module (bounds the bf16 quantization error).
    ref_q = reference(x, p, pre=pre, matmul_dtype=jnp.bfloat16)
    ref_f = reference(x, p, pre=pre, matmul_dtype=jnp.float32)
    np.testing.assert_allclose(np.asarray(out), np.asarray(ref_q),
                               atol=1e-2, rtol=1e-2)
    np.testing.assert_allclose(np.asarray(out), np.asarray(ref_f),
                               atol=6e-2, rtol=6e-2)


if __name__ == "__main__":
    key = jax.random.PRNGKey(0)
    k_x1, k_p1, k_x2, k_p2 = jax.random.split(key, 4)

    def conv_init(kw, kb, cout, cin):
        # PyTorch Conv2d default init range: U(-1/sqrt(fan_in), +1/sqrt(fan_in))
        bound = 1.0 / (cin ** 0.5)
        w = jax.random.uniform(kw, (cout, cin), jnp.float32, -bound, bound)
        b = jax.random.uniform(kb, (cout, 1), jnp.float32, -bound, bound)
        return w, b

    def make_params(key, cin, cout):
        ks = jax.random.split(key, 10)
        wl1, bl1 = conv_init(ks[0], ks[1], cout, cin)
        wl2, bl2 = conv_init(ks[2], ks[3], cout, cout)
        wr, br = conv_init(ks[4], ks[5], cout, cin)
        return dict(
            wl1=wl1, bl1=bl1, wl2=wl2, bl2=bl2, wr=wr, br=br,
            # BatchNorm2d affine params (perturbed from default 1/0 so the
            # fused gamma/beta path is actually exercised).
            g1=1.0 + 0.1 * jax.random.normal(ks[6], (cout, 1), jnp.float32),
            be1=0.1 * jax.random.normal(ks[7], (cout, 1), jnp.float32),
            g2=1.0 + 0.1 * jax.random.normal(ks[8], (cout, 1), jnp.float32),
            be2=0.1 * jax.random.normal(ks[9], (cout, 1), jnp.float32),
        )

    # Case 1: pre=True (projection residual, Cin != Cout).
    N, Cin, Cout, H, W = 2, 4, 8, 16, 16
    x = jax.random.normal(k_x1, (N, Cin, H, W), jnp.float32)
    p = make_params(k_p1, Cin, Cout)
    out = resnet_block(x, p, pre=True)
    jax.block_until_ready(out)
    assert out.shape == (N, Cout, H, W)
    _check(out, x, p, pre=True)

    # Case 2: pre=False (identity residual, Cin == Cout; wr/br never DMA'd).
    C = 8
    x2 = jax.random.normal(k_x2, (N, C, H, W), jnp.float32)
    p2 = make_params(k_p2, C, C)
    out2 = resnet_block(x2, p2, pre=False)
    jax.block_until_ready(out2)
    _check(out2, x2, p2, pre=False)

    print("KERNEL_OK")
</pallas_src>

<mosaic_0001>
module attributes {stable_mosaic.version = 11 : i64} {
  func.func @_stats1_kernel(%arg0: i32, %arg1: i32, %arg2: memref<1x4x256xbf16, #tpu.memory_space<vmem>>, %arg3: memref<8x4xbf16, #tpu.memory_space<vmem>>, %arg4: memref<1x8x1xf32, #tpu.memory_space<vmem>>, %arg5: memref<1x8x1xf32, #tpu.memory_space<vmem>>) attributes {dimension_semantics = [#tpu.dimension_semantics<parallel>, #tpu.dimension_semantics<arbitrary>], iteration_bounds = array<i64: 2, 1>, scalar_prefetch = 0 : i64, scratch_operands = 0 : i64, tpu.core_type = #tpu.core_type<tc>, window_params = [{transform_indices = @transform_0, window_bounds = array<i64: 1, 4, 256>}, {pipeline_mode = #tpu.pipeline_mode<synchronous>, transform_indices = @transform_1, window_bounds = array<i64: 8, 4>}, {transform_indices = @transform_2, window_bounds = array<i64: 1, 8, 1>}, {transform_indices = @transform_3, window_bounds = array<i64: 1, 8, 1>}]} {
    %c0 = arith.constant 0 : index
    %c0_0 = arith.constant 0 : index
    %0 = vector.load %arg3[%c0, %c0_0] : memref<8x4xbf16, #tpu.memory_space<vmem>>, vector<8x4xbf16>
    %c0_1 = arith.constant 0 : index
    %c0_2 = arith.constant 0 : index
    %c0_3 = arith.constant 0 : index
    %1 = vector.load %arg2[%c0_1, %c0_2, %c0_3] : memref<1x4x256xbf16, #tpu.memory_space<vmem>>, vector<1x4x256xbf16>
    %2 = vector.shape_cast %1 : vector<1x4x256xbf16> to vector<4x256xbf16>
    %cst = arith.constant dense<0.000000e+00> : vector<8x256xf32>
    %3 = tpu.matmul %0, %2, %cst {dimension_numbers = #tpu.dot_dimension_numbers<[1], [0], [0], [1], [0, 0, 1, 1], [], []>} : vector<8x4xbf16>, vector<4x256xbf16>, vector<8x256xf32> -> vector<8x256xf32>
    %c0_i32 = arith.constant 0 : i32
    %4 = arith.cmpi eq, %arg1, %c0_i32 : i32
    %5 = arith.extui %4 : i1 to i32
    %c0_i32_4 = arith.constant 0 : i32
    %6 = arith.cmpi ne, %5, %c0_i32_4 : i32
    scf.if %6 {
      %cst_19 = arith.constant 0.000000e+00 : f32
      %24 = vector.broadcast %cst_19 : f32 to vector<8x1xf32>
      %c0_20 = arith.constant 0 : index
      %c0_21 = arith.constant 0 : index
      %c0_22 = arith.constant 0 : index
      %25 = vector.load %arg4[%c0_20, %c0_21, %c0_22] : memref<1x8x1xf32, #tpu.memory_space<vmem>>, vector<1x8x1xf32>
      %26 = vector.shape_cast %25 : vector<1x8x1xf32> to vector<8x1xf32>
      %27 = vector.shape_cast %24 : vector<8x1xf32> to vector<1x8x1xf32>
      tpu.vector_store %arg4[%c0_20, %c0_21, %c0_22], %27 {strides = array<i32>} : memref<1x8x1xf32, #tpu.memory_space<vmem>>, vector<1x8x1xf32>,
      %cst_23 = arith.constant 0.000000e+00 : f32
      %28 = vector.broadcast %cst_23 : f32 to vector<8x1xf32>
      %c0_24 = arith.constant 0 : index
      %c0_25 = arith.constant 0 : index
      %c0_26 = arith.constant 0 : index
      %29 = vector.load %arg5[%c0_24, %c0_25, %c0_26] : memref<1x8x1xf32, #tpu.memory_space<vmem>>, vector<1x8x1xf32>
      %30 = vector.shape_cast %29 : vector<1x8x1xf32> to vector<8x1xf32>
      %31 = vector.shape_cast %28 : vector<8x1xf32> to vector<1x8x1xf32>
      tpu.vector_store %arg5[%c0_24, %c0_25, %c0_26], %31 {strides = array<i32>} : memref<1x8x1xf32, #tpu.memory_space<vmem>>, vector<1x8x1xf32>,
    } else {
    }
    %c0_5 = arith.constant 0 : index
    %c0_6 = arith.constant 0 : index
    %c0_7 = arith.constant 0 : index
    %7 = vector.load %arg4[%c0_5, %c0_6, %c0_7] : memref<1x8x1xf32, #tpu.memory_space<vmem>>, vector<1x8x1xf32>
    %8 = vector.shape_cast %7 : vector<1x8x1xf32> to vector<8x1xf32>
    %cst_8 = arith.constant dense<0.000000e+00> : vector<8xf32>
    %9 = vector.multi_reduction <add>, %3, %cst_8 [1] : vector<8x256xf32> to vector<8xf32>
    %10 = vector.shape_cast %9 : vector<8xf32> to vector<8x1xf32>
    %11 = arith.addf %8, %10 : vector<8x1xf32>
    %c0_9 = arith.constant 0 : index
    %c0_10 = arith.constant 0 : index
    %c0_11 = arith.constant 0 : index
    %12 = vector.load %arg4[%c0_9, %c0_10, %c0_11] : memref<1x8x1xf32, #tpu.memory_space<vmem>>, vector<1x8x1xf32>
    %13 = vector.shape_cast %12 : vector<1x8x1xf32> to vector<8x1xf32>
    %14 = vector.shape_cast %11 : vector<8x1xf32> to vector<1x8x1xf32>
    tpu.vector_store %arg4[%c0_9, %c0_10, %c0_11], %14 {strides = array<i32>} : memref<1x8x1xf32, #tpu.memory_space<vmem>>, vector<1x8x1xf32>,
    %c0_12 = arith.constant 0 : index
    %c0_13 = arith.constant 0 : index
    %c0_14 = arith.constant 0 : index
    %15 = vector.load %arg5[%c0_12, %c0_13, %c0_14] : memref<1x8x1xf32, #tpu.memory_space<vmem>>, vector<1x8x1xf32>
    %16 = vector.shape_cast %15 : vector<1x8x1xf32> to vector<8x1xf32>
    %17 = arith.mulf %3, %3 : vector<8x256xf32>
    %cst_15 = arith.constant dense<0.000000e+00> : vector<8xf32>
    %18 = vector.multi_reduction <add>, %17, %cst_15 [1] : vector<8x256xf32> to vector<8xf32>
    %19 = vector.shape_cast %18 : vector<8xf32> to vector<8x1xf32>
    %20 = arith.addf %16, %19 : vector<8x1xf32>
    %c0_16 = arith.constant 0 : index
    %c0_17 = arith.constant 0 : index
    %c0_18 = arith.constant 0 : index
    %21 = vector.load %arg5[%c0_16, %c0_17, %c0_18] : memref<1x8x1xf32, #tpu.memory_space<vmem>>, vector<1x8x1xf32>
    %22 = vector.shape_cast %21 : vector<1x8x1xf32> to vector<8x1xf32>
    %23 = vector.shape_cast %20 : vector<8x1xf32> to vector<1x8x1xf32>
    tpu.vector_store %arg5[%c0_16, %c0_17, %c0_18], %23 {strides = array<i32>} : memref<1x8x1xf32, #tpu.memory_space<vmem>>, vector<1x8x1xf32>,
    return
  }
  func.func @transform_0(%arg0: i32, %arg1: i32) -> (i32, i32, i32) {
    %c0_i32 = arith.constant 0 : i32
    %c0_i32_0 = arith.constant 0 : i32
    return %arg0, %c0_i32, %arg1 : i32, i32, i32
  }
  func.func @transform_1(%arg0: i32, %arg1: i32) -> (i32, i32) {
    %c0_i32 = arith.constant 0 : i32
    %c0_i32_0 = arith.constant 0 : i32
    %c0_i32_1 = arith.constant 0 : i32
    return %c0_i32, %c0_i32_0 : i32, i32
  }
  func.func @transform_2(%arg0: i32, %arg1: i32) -> (i32, i32, i32) {
    %c0_i32 = arith.constant 0 : i32
    %c0_i32_0 = arith.constant 0 : i32
    %c0_i32_1 = arith.constant 0 : i32
    return %arg0, %c0_i32, %c0_i32_0 : i32, i32, i32
  }
  func.func @transform_3(%arg0: i32, %arg1: i32) -> (i32, i32, i32) {
    %c0_i32 = arith.constant 0 : i32
    %c0_i32_0 = arith.constant 0 : i32
    %c0_i32_1 = arith.constant 0 : i32
    return %arg0, %c0_i32, %c0_i32_0 : i32, i32, i32
  }
}

module attributes {stable_mosaic.version = 11 : i64} {
  func.func @_stats2_kernel(%arg0: i32, %arg1: i32, %arg2: memref<1x4x256xbf16, #tpu.memory_space<vmem>>, %arg3: memref<8x4xbf16, #tpu.memory_space<vmem>>, %arg4: memref<8x8xbf16, #tpu.memory_space<vmem>>, %arg5: memref<1x8x2xf32, #tpu.memory_space<vmem>>, %arg6: memref<1x8x1xf32, #tpu.memory_space<vmem>>, %arg7: memref<1x8x1xf32, #tpu.memory_space<vmem>>) attributes {dimension_semantics = [#tpu.dimension_semantics<parallel>, #tpu.dimension_semantics<arbitrary>], iteration_bounds = array<i64: 2, 1>, scalar_prefetch = 0 : i64, scratch_operands = 0 : i64, tpu.core_type = #tpu.core_type<tc>, window_params = [{transform_indices = @transform_0, window_bounds = array<i64: 1, 4, 256>}, {pipeline_mode = #tpu.pipeline_mode<synchronous>, transform_indices = @transform_1, window_bounds = array<i64: 8, 4>}, {pipeline_mode = #tpu.pipeline_mode<synchronous>, transform_indices = @transform_2, window_bounds = array<i64: 8, 8>}, {transform_indices = @transform_3, window_bounds = array<i64: 1, 8, 2>}, {transform_indices = @transform_4, window_bounds = array<i64: 1, 8, 1>}, {transform_indices = @transform_5, window_bounds = array<i64: 1, 8, 1>}]} {
    %c0 = arith.constant 0 : index
    %c0_0 = arith.constant 0 : index
    %0 = vector.load %arg3[%c0, %c0_0] : memref<8x4xbf16, #tpu.memory_space<vmem>>, vector<8x4xbf16>
    %c0_1 = arith.constant 0 : index
    %c0_2 = arith.constant 0 : index
    %c0_3 = arith.constant 0 : index
    %1 = vector.load %arg2[%c0_1, %c0_2, %c0_3] : memref<1x4x256xbf16, #tpu.memory_space<vmem>>, vector<1x4x256xbf16>
    %2 = vector.shape_cast %1 : vector<1x4x256xbf16> to vector<4x256xbf16>
    %cst = arith.constant dense<0.000000e+00> : vector<8x256xf32>
    %3 = tpu.matmul %0, %2, %cst {dimension_numbers = #tpu.dot_dimension_numbers<[1], [0], [0], [1], [0, 0, 1, 1], [], []>} : vector<8x4xbf16>, vector<4x256xbf16>, vector<8x256xf32> -> vector<8x256xf32>
    %c0_4 = arith.constant 0 : index
    %c0_5 = arith.constant 0 : index
    %c0_6 = arith.constant 0 : index
    %4 = vector.load %arg5[%c0_4, %c0_5, %c0_6] : memref<1x8x2xf32, #tpu.memory_space<vmem>>, vector<1x8x1xf32>
    %5 = vector.shape_cast %4 : vector<1x8x1xf32> to vector<8x1xf32>
    %6 = vector.broadcast %5 : vector<8x1xf32> to vector<8x256xf32>
    %7 = arith.mulf %3, %6 : vector<8x256xf32>
    %c0_7 = arith.constant 0 : index
    %c0_8 = arith.constant 0 : index
    %c1 = arith.constant 1 : index
    %8 = vector.load %arg5[%c0_7, %c0_8, %c1] : memref<1x8x2xf32, #tpu.memory_space<vmem>>, vector<1x8x1xf32>
    %9 = vector.shape_cast %8 : vector<1x8x1xf32> to vector<8x1xf32>
    %10 = vector.broadcast %9 : vector<8x1xf32> to vector<8x256xf32>
    %11 = arith.addf %7, %10 : vector<8x256xf32>
    %cst_9 = arith.constant 0.000000e+00 : f32
    %12 = vector.broadcast %cst_9 : f32 to vector<8x256xf32>
    %13 = arith.maximumf %11, %12 : vector<8x256xf32>
    %c0_10 = arith.constant 0 : index
    %c0_11 = arith.constant 0 : index
    %14 = vector.load %arg4[%c0_10, %c0_11] : memref<8x8xbf16, #tpu.memory_space<vmem>>, vector<8x8xbf16>
    %15 = arith.truncf %13 : vector<8x256xf32> to vector<8x256xbf16>
    %cst_12 = arith.constant dense<0.000000e+00> : vector<8x256xf32>
    %16 = tpu.matmul %14, %15, %cst_12 {dimension_numbers = #tpu.dot_dimension_numbers<[1], [0], [0], [1], [0, 0, 1, 1], [], []>} : vector<8x8xbf16>, vector<8x256xbf16>, vector<8x256xf32> -> vector<8x256xf32>
    %c0_i32 = arith.constant 0 : i32
    %17 = arith.cmpi eq, %arg1, %c0_i32 : i32
    %18 = arith.extui %17 : i1 to i32
    %c0_i32_13 = arith.constant 0 : i32
    %19 = arith.cmpi ne, %18, %c0_i32_13 : i32
    scf.if %19 {
      %cst_28 = arith.constant 0.000000e+00 : f32
      %37 = vector.broadcast %cst_28 : f32 to vector<8x1xf32>
      %c0_29 = arith.constant 0 : index
      %c0_30 = arith.constant 0 : index
      %c0_31 = arith.constant 0 : index
      %38 = vector.load %arg6[%c0_29, %c0_30, %c0_31] : memref<1x8x1xf32, #tpu.memory_space<vmem>>, vector<1x8x1xf32>
      %39 = vector.shape_cast %38 : vector<1x8x1xf32> to vector<8x1xf32>
      %40 = vector.shape_cast %37 : vector<8x1xf32> to vector<1x8x1xf32>
      tpu.vector_store %arg6[%c0_29, %c0_30, %c0_31], %40 {strides = array<i32>} : memref<1x8x1xf32, #tpu.memory_space<vmem>>, vector<1x8x1xf32>,
      %cst_32 = arith.constant 0.000000e+00 : f32
      %41 = vector.broadcast %cst_32 : f32 to vector<8x1xf32>
      %c0_33 = arith.constant 0 : index
      %c0_34 = arith.constant 0 : index
      %c0_35 = arith.constant 0 : index
      %42 = vector.load %arg7[%c0_33, %c0_34, %c0_35] : memref<1x8x1xf32, #tpu.memory_space<vmem>>, vector<1x8x1xf32>
      %43 = vector.shape_cast %42 : vector<1x8x1xf32> to vector<8x1xf32>
      %44 = vector.shape_cast %41 : vector<8x1xf32> to vector<1x8x1xf32>
      tpu.vector_store %arg7[%c0_33, %c0_34, %c0_35], %44 {strides = array<i32>} : memref<1x8x1xf32, #tpu.memory_space<vmem>>, vector<1x8x1xf32>,
    } else {
    }
    %c0_14 = arith.constant 0 : index
    %c0_15 = arith.constant 0 : index
    %c0_16 = arith.constant 0 : index
    %20 = vector.load %arg6[%c0_14, %c0_15, %c0_16] : memref<1x8x1xf32, #tpu.memory_space<vmem>>, vector<1x8x1xf32>
    %21 = vector.shape_cast %20 : vector<1x8x1xf32> to vector<8x1xf32>
    %cst_17 = arith.constant dense<0.000000e+00> : vector<8xf32>
    %22 = vector.multi_reduction <add>, %16, %cst_17 [1] : vector<8x256xf32> to vector<8xf32>
    %23 = vector.shape_cast %22 : vector<8xf32> to vector<8x1xf32>
    %24 = arith.addf %21, %23 : vector<8x1xf32>
    %c0_18 = arith.constant 0 : index
    %c0_19 = arith.constant 0 : index
    %c0_20 = arith.constant 0 : index
    %25 = vector.load %arg6[%c0_18, %c0_19, %c0_20] : memref<1x8x1xf32, #tpu.memory_space<vmem>>, vector<1x8x1xf32>
    %26 = vector.shape_cast %25 : vector<1x8x1xf32> to vector<8x1xf32>
    %27 = vector.shape_cast %24 : vector<8x1xf32> to vector<1x8x1xf32>
    tpu.vector_store %arg6[%c0_18, %c0_19, %c0_20], %27 {strides = array<i32>} : memref<1x8x1xf32, #tpu.memory_space<vmem>>, vector<1x8x1xf32>,
    %c0_21 = arith.constant 0 : index
    %c0_22 = arith.constant 0 : index
    %c0_23 = arith.constant 0 : index
    %28 = vector.load %arg7[%c0_21, %c0_22, %c0_23] : memref<1x8x1xf32, #tpu.memory_space<vmem>>, vector<1x8x1xf32>
    %29 = vector.shape_cast %28 : vector<1x8x1xf32> to vector<8x1xf32>
    %30 = arith.mulf %16, %16 : vector<8x256xf32>
    %cst_24 = arith.constant dense<0.000000e+00> : vector<8xf32>
    %31 = vector.multi_reduction <add>, %30, %cst_24 [1] : vector<8x256xf32> to vector<8xf32>
    %32 = vector.shape_cast %31 : vector<8xf32> to vector<8x1xf32>
    %33 = arith.addf %29, %32 : vector<8x1xf32>
    %c0_25 = arith.constant 0 : index
    %c0_26 = arith.constant 0 : index
    %c0_27 = arith.constant 0 : index
    %34 = vector.load %arg7[%c0_25, %c0_26, %c0_27] : memref<1x8x1xf32, #tpu.memory_space<vmem>>, vector<1x8x1xf32>
    %35 = vector.shape_cast %34 : vector<1x8x1xf32> to vector<8x1xf32>
    %36 = vector.shape_cast %33 : vector<8x1xf32> to vector<1x8x1xf32>
    tpu.vector_store %arg7[%c0_25, %c0_26, %c0_27], %36 {strides = array<i32>} : memref<1x8x1xf32, #tpu.memory_space<vmem>>, vector<1x8x1xf32>,
    return
  }
  func.func @transform_0(%arg0: i32, %arg1: i32) -> (i32, i32, i32) {
    %c0_i32 = arith.constant 0 : i32
    %c0_i32_0 = arith.constant 0 : i32
    return %arg0, %c0_i32, %arg1 : i32, i32, i32
  }
  func.func @transform_1(%arg0: i32, %arg1: i32) -> (i32, i32) {
    %c0_i32 = arith.constant 0 : i32
    %c0_i32_0 = arith.constant 0 : i32
    %c0_i32_1 = arith.constant 0 : i32
    return %c0_i32, %c0_i32_0 : i32, i32
  }
  func.func @transform_2(%arg0: i32, %arg1: i32) -> (i32, i32) {
    %c0_i32 = arith.constant 0 : i32
    %c0_i32_0 = arith.constant 0 : i32
    %c0_i32_1 = arith.constant 0 : i32
    return %c0_i32, %c0_i32_0 : i32, i32
  }
  func.func @transform_3(%arg0: i32, %arg1: i32) -> (i32, i32, i32) {
    %c0_i32 = arith.constant 0 : i32
    %c0_i32_0 = arith.constant 0 : i32
    %c0_i32_1 = arith.constant 0 : i32
    return %arg0, %c0_i32, %c0_i32_0 : i32, i32, i32
  }
  func.func @transform_4(%arg0: i32, %arg1: i32) -> (i32, i32, i32) {
    %c0_i32 = arith.constant 0 : i32
    %c0_i32_0 = arith.constant 0 : i32
    %c0_i32_1 = arith.constant 0 : i32
    return %arg0, %c0_i32, %c0_i32_0 : i32, i32, i32
  }
  func.func @transform_5(%arg0: i32, %arg1: i32) -> (i32, i32, i32) {
    %c0_i32 = arith.constant 0 : i32
    %c0_i32_0 = arith.constant 0 : i32
    %c0_i32_1 = arith.constant 0 : i32
    return %arg0, %c0_i32, %c0_i32_0 : i32, i32, i32
  }
}

module attributes {stable_mosaic.version = 11 : i64} {
  func.func @_out_kernel(%arg0: i32, %arg1: i32, %arg2: memref<1x4x256xbf16, #tpu.memory_space<vmem>>, %arg3: memref<8x4xbf16, #tpu.memory_space<vmem>>, %arg4: memref<8x8xbf16, #tpu.memory_space<vmem>>, %arg5: memref<1x8x2xf32, #tpu.memory_space<vmem>>, %arg6: memref<1x8x2xf32, #tpu.memory_space<vmem>>, %arg7: memref<8x4xbf16, #tpu.memory_space<vmem>>, %arg8: memref<1x8x256xf32, #tpu.memory_space<vmem>>) attributes {dimension_semantics = [#tpu.dimension_semantics<parallel>, #tpu.dimension_semantics<parallel>], iteration_bounds = array<i64: 2, 1>, scalar_prefetch = 0 : i64, scratch_operands = 0 : i64, tpu.core_type = #tpu.core_type<tc>, window_params = [{transform_indices = @transform_0, window_bounds = array<i64: 1, 4, 256>}, {pipeline_mode = #tpu.pipeline_mode<synchronous>, transform_indices = @transform_1, window_bounds = array<i64: 8, 4>}, {pipeline_mode = #tpu.pipeline_mode<synchronous>, transform_indices = @transform_2, window_bounds = array<i64: 8, 8>}, {transform_indices = @transform_3, window_bounds = array<i64: 1, 8, 2>}, {transform_indices = @transform_4, window_bounds = array<i64: 1, 8, 2>}, {pipeline_mode = #tpu.pipeline_mode<synchronous>, transform_indices = @transform_5, window_bounds = array<i64: 8, 4>}, {transform_indices = @transform_6, window_bounds = array<i64: 1, 8, 256>}]} {
    %c0 = arith.constant 0 : index
    %c0_0 = arith.constant 0 : index
    %c0_1 = arith.constant 0 : index
    %0 = vector.load %arg2[%c0, %c0_0, %c0_1] : memref<1x4x256xbf16, #tpu.memory_space<vmem>>, vector<1x4x256xbf16>
    %1 = vector.shape_cast %0 : vector<1x4x256xbf16> to vector<4x256xbf16>
    %c0_2 = arith.constant 0 : index
    %c0_3 = arith.constant 0 : index
    %2 = vector.load %arg3[%c0_2, %c0_3] : memref<8x4xbf16, #tpu.memory_space<vmem>>, vector<8x4xbf16>
    %cst = arith.constant dense<0.000000e+00> : vector<8x256xf32>
    %3 = tpu.matmul %2, %1, %cst {dimension_numbers = #tpu.dot_dimension_numbers<[1], [0], [0], [1], [0, 0, 1, 1], [], []>} : vector<8x4xbf16>, vector<4x256xbf16>, vector<8x256xf32> -> vector<8x256xf32>
    %c0_4 = arith.constant 0 : index
    %c0_5 = arith.constant 0 : index
    %c0_6 = arith.constant 0 : index
    %4 = vector.load %arg5[%c0_4, %c0_5, %c0_6] : memref<1x8x2xf32, #tpu.memory_space<vmem>>, vector<1x8x1xf32>
    %5 = vector.shape_cast %4 : vector<1x8x1xf32> to vector<8x1xf32>
    %6 = vector.broadcast %5 : vector<8x1xf32> to vector<8x256xf32>
    %7 = arith.mulf %3, %6 : vector<8x256xf32>
    %c0_7 = arith.constant 0 : index
    %c0_8 = arith.constant 0 : index
    %c1 = arith.constant 1 : index
    %8 = vector.load %arg5[%c0_7, %c0_8, %c1] : memref<1x8x2xf32, #tpu.memory_space<vmem>>, vector<1x8x1xf32>
    %9 = vector.shape_cast %8 : vector<1x8x1xf32> to vector<8x1xf32>
    %10 = vector.broadcast %9 : vector<8x1xf32> to vector<8x256xf32>
    %11 = arith.addf %7, %10 : vector<8x256xf32>
    %cst_9 = arith.constant 0.000000e+00 : f32
    %12 = vector.broadcast %cst_9 : f32 to vector<8x256xf32>
    %13 = arith.maximumf %11, %12 : vector<8x256xf32>
    %c0_10 = arith.constant 0 : index
    %c0_11 = arith.constant 0 : index
    %14 = vector.load %arg4[%c0_10, %c0_11] : memref<8x8xbf16, #tpu.memory_space<vmem>>, vector<8x8xbf16>
    %15 = arith.truncf %13 : vector<8x256xf32> to vector<8x256xbf16>
    %cst_12 = arith.constant dense<0.000000e+00> : vector<8x256xf32>
    %16 = tpu.matmul %14, %15, %cst_12 {dimension_numbers = #tpu.dot_dimension_numbers<[1], [0], [0], [1], [0, 0, 1, 1], [], []>} : vector<8x8xbf16>, vector<8x256xbf16>, vector<8x256xf32> -> vector<8x256xf32>
    %c0_13 = arith.constant 0 : index
    %c0_14 = arith.constant 0 : index
    %c0_15 = arith.constant 0 : index
    %17 = vector.load %arg6[%c0_13, %c0_14, %c0_15] : memref<1x8x2xf32, #tpu.memory_space<vmem>>, vector<1x8x1xf32>
    %18 = vector.shape_cast %17 : vector<1x8x1xf32> to vector<8x1xf32>
    %19 = vector.broadcast %18 : vector<8x1xf32> to vector<8x256xf32>
    %20 = arith.mulf %16, %19 : vector<8x256xf32>
    %c0_16 = arith.constant 0 : index
    %c0_17 = arith.constant 0 : index
    %c1_18 = arith.constant 1 : index
    %21 = vector.load %arg6[%c0_16, %c0_17, %c1_18] : memref<1x8x2xf32, #tpu.memory_space<vmem>>, vector<1x8x1xf32>
    %22 = vector.shape_cast %21 : vector<1x8x1xf32> to vector<8x1xf32>
    %23 = vector.broadcast %22 : vector<8x1xf32> to vector<8x256xf32>
    %24 = arith.addf %20, %23 : vector<8x256xf32>
    %c0_19 = arith.constant 0 : index
    %c0_20 = arith.constant 0 : index
    %25 = vector.load %arg7[%c0_19, %c0_20] : memref<8x4xbf16, #tpu.memory_space<vmem>>, vector<8x4xbf16>
    %cst_21 = arith.constant dense<0.000000e+00> : vector<8x256xf32>
    %26 = tpu.matmul %25, %1, %cst_21 {dimension_numbers = #tpu.dot_dimension_numbers<[1], [0], [0], [1], [0, 0, 1, 1], [], []>} : vector<8x4xbf16>, vector<4x256xbf16>, vector<8x256xf32> -> vector<8x256xf32>
    %27 = arith.addf %24, %26 : vector<8x256xf32>
    %cst_22 = arith.constant 0.000000e+00 : f32
    %28 = vector.broadcast %cst_22 : f32 to vector<8x256xf32>
    %29 = arith.maximumf %27, %28 : vector<8x256xf32>
    %c0_23 = arith.constant 0 : index
    %c0_24 = arith.constant 0 : index
    %c0_25 = arith.constant 0 : index
    %30 = vector.load %arg8[%c0_23, %c0_24, %c0_25] : memref<1x8x256xf32, #tpu.memory_space<vmem>>, vector<1x8x256xf32>
    %31 = vector.shape_cast %30 : vector<1x8x256xf32> to vector<8x256xf32>
    %32 = vector.shape_cast %29 : vector<8x256xf32> to vector<1x8x256xf32>
    tpu.vector_store %arg8[%c0_23, %c0_24, %c0_25], %32 {strides = array<i32>} : memref<1x8x256xf32, #tpu.memory_space<vmem>>, vector<1x8x256xf32>,
    return
  }
  func.func @transform_0(%arg0: i32, %arg1: i32) -> (i32, i32, i32) {
    %c0_i32 = arith.constant 0 : i32
    %c0_i32_0 = arith.constant 0 : i32
    return %arg0, %c0_i32, %arg1 : i32, i32, i32
  }
  func.func @transform_1(%arg0: i32, %arg1: i32) -> (i32, i32) {
    %c0_i32 = arith.constant 0 : i32
    %c0_i32_0 = arith.constant 0 : i32
    %c0_i32_1 = arith.constant 0 : i32
    return %c0_i32, %c0_i32_0 : i32, i32
  }
  func.func @transform_2(%arg0: i32, %arg1: i32) -> (i32, i32) {
    %c0_i32 = arith.constant 0 : i32
    %c0_i32_0 = arith.constant 0 : i32
    %c0_i32_1 = arith.constant 0 : i32
    return %c0_i32, %c0_i32_0 : i32, i32
  }
  func.func @transform_3(%arg0: i32, %arg1: i32) -> (i32, i32, i32) {
    %c0_i32 = arith.constant 0 : i32
    %c0_i32_0 = arith.constant 0 : i32
    %c0_i32_1 = arith.constant 0 : i32
    return %arg0, %c0_i32, %c0_i32_0 : i32, i32, i32
  }
  func.func @transform_4(%arg0: i32, %arg1: i32) -> (i32, i32, i32) {
    %c0_i32 = arith.constant 0 : i32
    %c0_i32_0 = arith.constant 0 : i32
    %c0_i32_1 = arith.constant 0 : i32
    return %arg0, %c0_i32, %c0_i32_0 : i32, i32, i32
  }
  func.func @transform_5(%arg0: i32, %arg1: i32) -> (i32, i32) {
    %c0_i32 = arith.constant 0 : i32
    %c0_i32_0 = arith.constant 0 : i32
    %c0_i32_1 = arith.constant 0 : i32
    return %c0_i32, %c0_i32_0 : i32, i32
  }
  func.func @transform_6(%arg0: i32, %arg1: i32) -> (i32, i32, i32) {
    %c0_i32 = arith.constant 0 : i32
    %c0_i32_0 = arith.constant 0 : i32
    return %arg0, %c0_i32, %arg1 : i32, i32, i32
  }
}

</mosaic_0001>

<bundles_post_ra>
// kernel: resnet_block.3
= control target key start
LH: loop header
LB: loop body
LE: loop exit
PB: predicated region body
PF: predicated region fallthrough
CT: control target
= control target key end

     0   :  { %s479_s12 = smov 0   ;;  %s481_s13 = smov 0   ;;  %s522_s0 = inlined_call_operand.vmem [shape: bf16[2,4,256], index: 0, kind: input, shape index: {}]   ;;  %s523_s1 = inlined_call_operand.vmem [shape: bf16[8,4], index: 1, kind: input, shape index: {}]   ;;  %s524_s2 = inlined_call_operand.vmem [shape: f32[2,8,1], index: 2, kind: output, shape index: {0}]   ;;  %s525_s3 = inlined_call_operand.vmem [shape: f32[2,8,1], index: 3, kind: output, shape index: {1}]  }
   0x1   :  { %s483_s14 = smov 0  }
   0x2 LB: > { %s26_s15 = sadd.s32 1, %s451_s13  ;;  %p396_p0 = scmp.ge.s32.totalorder %s455_s14, 1  ;;  %s455_s14 = sphi %s483_s14, %s14_s14   ;;  %s451_s13 = sphi %s481_s13, %s527_s13   ;;  %s447_s12 = sphi %s479_s12, %s526_s12  }
   0x3   : > { %p28_p1 = scmp.ge.s32.totalorder %s26_s15, 2  ;;  %p159_p2 = scmp.lt.s32.totalorder %s455_s14, 3 }
   0x5   : > { %s529_s15 = smov (%p28_p1, %s26_s15), 0  ;;  %p160_p3 = pnand %p396_p0, %p159_p2 }
   0x6   : > { %p191_p4 = scmp.lt.s32.totalorder (!%p160_p3), %s447_s12, 1 }
   0x7   : > { %163 = sbr.rel (%p160_p3) target bundleno = 364 (0x16c), region = 28 }
   0xc   : > { %v457_v0 = vmov 0   ;;  %s531_s12 = smov (!%p191_p4, %s447_s12), 1  ;;  %vm224_vm0 = vcmask 1041408   ;;  %v209_v4 = vld [vmem:[%s523_s1] sm:$0xf]  ;;  %vm220_vm1 = vcmask 31744  }
   0xd   : > { %263 = vmatprep.mubr.bf16.mxu0 %v457_v0  ;;  %s406_s16 = sshll.u32 %s531_s12, 2  ;;  %s399_s22 = sshll.u32 %s531_s12, 3  ;;  %vm276_vm2 = vcmask 7168   ;;  %v458_v5 = vmov 0.0  }
   0xe   : > { %s198_s19 = scalar_lea.vmem %s522_s0, %s406_s16  ;;  %s203_s25 = scalar_lea.vmem %s524_s2, %s399_s22 }
   0xf   : > { %v401_v1 = vld.sshfl [vmem:[%s198_s19] sm:$0x33 pattern:$0x76325410]  ;;  %277 = vst.msk [vmem:[%s203_s25] sm:$0xff] %vm276_vm2, %v458_v5  ;;  %s207_s28 = scalar_lea.vmem %s525_s3, %s399_s22 }
  0x10   : > { %v219_v2 = vcombine.high %v401_v1, %v401_v1  ;;  %v226_v3 = vsel %vm224_vm0, %v401_v1, 0  ;;  %278 = vst.msk [vmem:[%s207_s28] sm:$0xff] %vm276_vm2, %v458_v5 }
  0x12   : > { %402 = vmatprep.subr.msk.bf16.mxu0 %vm224_vm0, %v219_v2 }
  0x13   : > { %246 = vmatpush1.bf16.msra.mxu0 %v226_v3 }
  0x16   : > { %403 = vmatmul.mubr.msk.bf16.vlgmr.msra.gmra.mxu0 %vm220_vm1, %v209_v4  ;;  %v279_v14 = vld [vmem:[%s203_s25] sm:$0xff] }
  0x17   : > { %v286_v17 = vld [vmem:[%s207_s28] sm:$0xff] }
  0xd6   : > { %v265_v6 = vpop.f32.mrf.mxu0 }
  0xd7   : > { %v287_v11 = vmul.f32 %v265_v6, %v265_v6 }
  0xd8   : > { %v267_v7 = vpop.f32.mrf.mxu0 }
  0xd9   : > { %v288_v8 = vmul.f32 %v267_v7, %v267_v7  ;;  %v280_v9 = vadd.f32 %v267_v7, %v265_v6 }
  0xda   : > { %v269_v10 = vpop.f32.mrf.mxu0 }
  0xdb   : > { %281 = vadd.xlane.f32.xlu0 %v280_v9  ;;  %v289_v13 = vadd.f32 %v288_v8, %v287_v11 }
  0xdc   : > { %v270_v12 = vpop.f32.mrf.mxu0 }
  0xdf   : > { %290 = vadd.xlane.f32.xlu0 %v289_v13 }
 0x164   : > { %v282_v15 = vpop.xlane.xlu0 %281 }
 0x165   : > { %v283_v16 = vadd.f32 %v282_v15, %v279_v14 }
 0x167   : > { %285 = vst.msk [vmem:[%s203_s25] sm:$0xff] %vm276_vm2, %v283_v16 }
 0x168   : > { %v291_v18 = vpop.xlane.xlu0 %290 }
 0x169   : > { %v292_v19 = vadd.f32 %v291_v18, %v286_v17 }
 0x16b   : > { %293 = vst.msk [vmem:[%s207_s28] sm:$0xff] %vm276_vm2, %v292_v19 }
 0x16c PF: > { %s14_s14 = sadd.s32 1, %s455_s14   ;;  %s526_s12 = smov %s451_s13 }
 0x16d   : > { %p11_p5 = scmp.ge.s32.totalorder %s14_s14, 4   ;;  %s527_s13 = smov %s529_s15 }
 0x16f   :  { %13 = sbr.rel (!%p11_p5) target bundleno = 2 (0x2), region = 74 }

// kernel: resnet_block.4
= control target key start
LH: loop header
LB: loop body
LE: loop exit
PB: predicated region body
PF: predicated region fallthrough
CT: control target
= control target key end

     0   :  { %s650_s18 = smov 0   ;;  %s652_s19 = smov 0   ;;  %s704_s0 = inlined_call_operand.vmem [shape: bf16[2,4,256], index: 0, kind: input, shape index: {}]   ;;  %s705_s1 = inlined_call_operand.vmem [shape: bf16[8,4], index: 1, kind: input, shape index: {}]   ;;  %s706_s2 = inlined_call_operand.vmem [shape: bf16[8,8], index: 2, kind: input, shape index: {}]   ;;  %s707_s3 = inlined_call_operand.vmem [shape: f32[2,8,2], index: 3, kind: input, shape index: {}]   ;;  %s708_s4 = inlined_call_operand.vmem [shape: f32[2,8,1], index: 4, kind: output, shape index: {0}]   ;;  %s709_s5 = inlined_call_operand.vmem [shape: f32[2,8,1], index: 5, kind: output, shape index: {1}]  }
   0x1   :  { %s654_s20 = smov 0  }
   0x2 LB: > { %s28_s21 = sadd.s32 1, %s611_s19  ;;  %p550_p0 = scmp.ge.s32.totalorder %s615_s20, 1  ;;  %s615_s20 = sphi %s654_s20, %s16_s20   ;;  %s611_s19 = sphi %s652_s19, %s711_s19   ;;  %s607_s18 = sphi %s650_s18, %s710_s18  }
   0x3   : > { %p30_p1 = scmp.ge.s32.totalorder %s28_s21, 2  ;;  %p218_p2 = scmp.lt.s32.totalorder %s615_s20, 3 }
   0x5   : > { %s713_s21 = smov (%p30_p1, %s28_s21), 0  ;;  %p219_p3 = pnand %p550_p0, %p218_p2 }
   0x6   : > { %p258_p4 = scmp.lt.s32.totalorder (!%p219_p3), %s607_s18, 1 }
   0x7   : > { %222 = sbr.rel (%p219_p3) target bundleno = 571 (0x23b), region = 36 }
   0xc   : > { %v617_v0 = vmov 0   ;;  %s715_s18 = smov (!%p258_p4, %s607_s18), 1  ;;  %vm295_vm0 = vcmask 1041408   ;;  %v280_v5 = vld [vmem:[%s705_s1] sm:$0xf]  ;;  %vm291_vm1 = vcmask 31744  }
   0xd   : > { %334 = vmatprep.mubr.bf16.mxu0 %v617_v0  ;;  %591 = vset.pattern.permute.xlu0 %v617_v0  ;;  %s563_s22 = sshll.u32 %s715_s18, 2  ;;  %s668_s23 = sshll.u32 %s715_s18, 3  ;;  %v618_v6 = vmov 1   ;;  %vm366_vm2 = vcmask 1043456   ;;  %v359_v22 = vld [vmem:[%s706_s2] sm:$0xf] }
   0xe   : > { %405 = vmatprep.mubr.bf16.mxu1 %v617_v0  ;;  %s265_s26 = scalar_lea.vmem %s704_s0, %s563_s22  ;;  %s270_s29 = scalar_lea.vmem %s707_s3, %s668_s23  ;;  %vm362_vm3 = vcmask 64512   ;;  %vm418_vm4 = vcmask 7168   ;;  %v619_v23 = vmov 0.0  }
   0xf   : > { %v556_v1 = vld.sshfl [vmem:[%s265_s26] sm:$0x33 pattern:$0x76325410]  ;;  %s274_s11 = scalar_lea.vmem %s708_s4, %s668_s23  ;;  %s278_s14 = scalar_lea.vmem %s709_s5, %s668_s23 }
  0x10   : > { %v343_v2 = vld [vmem:[%s270_s29] sm:$0xff]  ;;  %v290_v3 = vcombine.high %v556_v1, %v556_v1  ;;  %v297_v4 = vsel %vm295_vm0, %v556_v1, 0  ;;  %419 = vst.msk [vmem:[%s274_s11] sm:$0xff] %vm418_vm4, %v619_v23  ;;  %420 = vst.msk [vmem:[%s278_s14] sm:$0xff] %vm418_vm4, %v619_v23 }
  0x11   : > { %346 = vperm.xlu0 %591, %v343_v2  }
  0x12   : > { %557 = vmatprep.subr.msk.bf16.mxu0 %vm295_vm0, %v290_v3 }
  0x13   : > { %317 = vmatpush1.bf16.msra.mxu0 %v297_v4 }
  0x15   : > { %592 = vset.pattern.permute.xlu0 %v618_v6 }
  0x16   : > { %352 = vperm.xlu0 %592, %v343_v2   ;;  %558 = vmatmul.mubr.msk.bf16.vlgmr.msra.gmra.mxu0 %vm291_vm1, %v280_v5 }
  0x17   : > { %v421_v32 = vld [vmem:[%s274_s11] sm:$0xff] }
  0x18   : > { %v428_v35 = vld [vmem:[%s278_s14] sm:$0xff] }
  0x8c   : > { %v347_v7 = vpop.permute.xlu0 %346 }
  0x91   : > { %v353_v9 = vpop.permute.xlu0 %352 }
  0xd6   : > { %v336_v8 = vpop.f32.mrf.mxu0 }
  0xd7   : > { %v349_v10 = vmul.f32 %v347_v7, %v336_v8 }
  0xd8   : > { %v338_v11 = vpop.f32.mrf.mxu0 }
  0xd9   : > { %v355_v12 = vadd.f32 %v353_v9, %v349_v10  ;;  %v350_v13 = vmul.f32 %v347_v7, %v338_v11 }
  0xda   : > { %v340_v14 = vpop.f32.mrf.mxu0 }
  0xdb   : > { %v357_v15 = vmax.f32 %v355_v12, 0.0  ;;  %v356_v16 = vadd.f32 %v353_v9, %v350_v13 }
  0xdc   : > { %v341_v17 = vpop.f32.mrf.mxu0 }
  0xdd   : > { %v360_v18 = vpack.c.bf16 %v357_v15, %v357_v15  ;;  %v358_v19 = vmax.f32 %v356_v16, 0.0 }
  0xdf   : > { %v361_v20 = vpack.c.bf16 %v358_v19, %v358_v19  ;;  %v368_v21 = vsel %vm366_vm2, %v360_v18, 0 }
  0xe1   : > { %559 = vmatprep.subr.msk.bf16.mxu1 %vm366_vm2, %v361_v20 }
  0xe2   : > { %388 = vmatpush1.bf16.msra.mxu1 %v368_v21 }
  0xe5   : > { %560 = vmatmul.mubr.msk.bf16.vlgmr.msra.gmra.mxu1 %vm362_vm3, %v359_v22 }
 0x1a5   : > { %v407_v24 = vpop.f32.mrf.mxu1 }
 0x1a6   : > { %v429_v29 = vmul.f32 %v407_v24, %v407_v24 }
 0x1a7   : > { %v409_v25 = vpop.f32.mrf.mxu1 }
 0x1a8   : > { %v430_v26 = vmul.f32 %v409_v25, %v409_v25  ;;  %v422_v27 = vadd.f32 %v409_v25, %v407_v24 }
 0x1a9   : > { %v411_v28 = vpop.f32.mrf.mxu1 }
 0x1aa   : > { %423 = vadd.xlane.f32.xlu1 %v422_v27  ;;  %v431_v31 = vadd.f32 %v430_v26, %v429_v29 }
 0x1ab   : > { %v412_v30 = vpop.f32.mrf.mxu1 }
 0x1ae   : > { %432 = vadd.xlane.f32.xlu1 %v431_v31 }
 0x233   : > { %v424_v33 = vpop.xlane.xlu1 %423 }
 0x234   : > { %v425_v34 = vadd.f32 %v424_v33, %v421_v32 }
 0x236   : > { %427 = vst.msk [vmem:[%s274_s11] sm:$0xff] %vm418_vm4, %v425_v34 }
 0x237   : > { %v433_v36 = vpop.xlane.xlu1 %432 }
 0x238   : > { %v434_v37 = vadd.f32 %v433_v36, %v428_v35 }
 0x23a   : > { %435 = vst.msk [vmem:[%s278_s14] sm:$0xff] %vm418_vm4, %v434_v37 }
 0x23b PF: > { %s16_s20 = sadd.s32 1, %s615_s20   ;;  %s710_s18 = smov %s611_s19 }
 0x23c   : > { %p13_p5 = scmp.ge.s32.totalorder %s16_s20, 4   ;;  %s711_s19 = smov %s713_s21 }
 0x23e   :  { %15 = sbr.rel (!%p13_p5) target bundleno = 2 (0x2), region = 85 }

// kernel: resnet_block.5
= control target key start
LH: loop header
LB: loop body
LE: loop exit
PB: predicated region body
PF: predicated region fallthrough
CT: control target
= control target key end

     0   :  { %s749_s21 = smov 0   ;;  %s751_s22 = smov 0   ;;  %s802_s0 = inlined_call_operand.vmem [shape: bf16[2,4,256], index: 0, kind: input, shape index: {}]   ;;  %s803_s1 = inlined_call_operand.vmem [shape: bf16[8,4], index: 1, kind: input, shape index: {}]   ;;  %s804_s2 = inlined_call_operand.vmem [shape: bf16[8,8], index: 2, kind: input, shape index: {}]   ;;  %s805_s3 = inlined_call_operand.vmem [shape: f32[2,8,2], index: 3, kind: input, shape index: {}]   ;;  %s806_s4 = inlined_call_operand.vmem [shape: f32[2,8,2], index: 4, kind: input, shape index: {}]   ;;  %s807_s5 = inlined_call_operand.vmem [shape: bf16[8,4], index: 5, kind: input, shape index: {}]   ;;  %s808_s6 = inlined_call_operand.vmem [shape: f32[2,8,256], index: 6, kind: output, shape index: {}]  }
   0x1   :  { %s753_s23 = smov 0  }
   0x2 LB: > { %s28_s24 = sadd.s32 1, %s706_s22  ;;  %p640_p0 = scmp.ge.s32.totalorder %s710_s23, 1  ;;  %s710_s23 = sphi %s753_s23, %s16_s23   ;;  %s706_s22 = sphi %s751_s22, %s810_s22   ;;  %s702_s21 = sphi %s749_s21, %s809_s21  }
   0x3   : > { %p30_p1 = scmp.ge.s32.totalorder %s28_s24, 2  ;;  %p251_p2 = scmp.lt.s32.totalorder %s710_s23, 3 }
   0x5   : > { %s812_s24 = smov (%p30_p1, %s28_s24), 0  ;;  %p252_p3 = pnand %p640_p0, %p251_p2 }
   0x6   : > { %p298_p4 = scmp.lt.s32.totalorder (!%p252_p3), %s702_s21, 1 }
   0x7   : > { %255 = sbr.rel (%p252_p3) target bundleno = 433 (0x1b1), region = 44 }
   0xc   : > { %v712_v0 = vmov 0   ;;  %s814_s21 = smov (!%p298_p4, %s702_s21), 1  ;;  %vm341_vm0 = vcmask 1041408   ;;  %v327_v5 = vld [vmem:[%s803_s1] sm:$0xf]  ;;  %vm337_vm1 = vcmask 31744  }
   0xd   : > { %380 = vmatprep.mubr.bf16.mxu0 %v712_v0  ;;  %684 = vset.pattern.permute.xlu0 %v712_v0  ;;  %s656_s25 = sshll.u32 %s814_s21, 2  ;;  %s643_s26 = sshll.u32 %s814_s21, 3  ;;  %v713_v6 = vmov 1   ;;  %v474_v7 = vld [vmem:[%s807_s5] sm:$0xf]  ;;  %vm412_vm2 = vcmask 1043456  }
   0xe   : > { %451 = vmatprep.mubr.bf16.mxu1 %v712_v0  ;;  %686 = vset.pattern.permute.xlu1 %v712_v0  ;;  %s305_s29 = scalar_lea.vmem %s802_s0, %s656_s25  ;;  %s310_s8 = scalar_lea.vmem %s805_s3, %s643_s26  ;;  %v405_v24 = vld [vmem:[%s804_s2] sm:$0xf]  ;;  %vm408_vm3 = vcmask 64512  }
   0xf   : > { %v647_v1 = vld.sshfl [vmem:[%s305_s29] sm:$0x33 pattern:$0x76325410]  ;;  %s314_s15 = scalar_lea.vmem %s806_s4, %s643_s26  ;;  %s657_s18 = sshll.u32 %s814_s21, 4 }
  0x10   : > { %v389_v2 = vld [vmem:[%s310_s8] sm:$0xff]  ;;  %v336_v3 = vcombine.high %v647_v1, %v647_v1  ;;  %v343_v4 = vsel %vm341_vm0, %v647_v1, 0  ;;  %s323_s25 = scalar_lea.vmem %s808_s6, %s657_s18 }
  0x11   : > { %392 = vperm.xlu0 %684, %v389_v2   ;;  %v460_v8 = vld [vmem:[%s314_s15] sm:$0xff] }
  0x12   : > { %648 = vmatprep.subr.msk.bf16.mxu0 %vm341_vm0, %v336_v3  ;;  %463 = vperm.xlu1 %686, %v460_v8  }
  0x13   : > { %363 = vmatpush1.bf16.msra.mxu0 %v343_v4 }
  0x14   : > { %652 = vmatprep.subr.msk.bf16.mxu0 %vm341_vm0, %v336_v3 }
  0x15   : > { %685 = vset.pattern.permute.xlu0 %v713_v6 }
  0x16   : > { %398 = vperm.xlu0 %685, %v389_v2   ;;  %649 = vmatmul.mubr.msk.bf16.vlgmr.msra.gmra.mxu0 %vm337_vm1, %v327_v5 }
  0x17   : > { %493 = vmatpush1.bf16.msra.mxu0 %v343_v4  ;;  %510 = vmatprep.mubr.bf16.mxu0 %v712_v0 }
  0x18   : > { %687 = vset.pattern.permute.xlu1 %v713_v6 }
  0x19   : > { %469 = vperm.xlu1 %687, %v460_v8  }
  0x1e   : > { %653 = vmatmul.mubr.msk.bf16.vlgmr.msra.gmra.mxu0 %vm337_vm1, %v474_v7 }
  0x8c   : > { %v393_v9 = vpop.permute.xlu0 %392 }
  0x8d   : > { %v464_v29 = vpop.permute.xlu1 %463 }
  0x91   : > { %v399_v11 = vpop.permute.xlu0 %398 }
  0x94   : > { %v470_v31 = vpop.permute.xlu1 %469 }
  0xd6   : > { %v382_v10 = vpop.f32.mrf.mxu0 }
  0xd7   : > { %v395_v12 = vmul.f32 %v393_v9, %v382_v10 }
  0xd8   : > { %v384_v13 = vpop.f32.mrf.mxu0 }
  0xd9   : > { %v401_v14 = vadd.f32 %v399_v11, %v395_v12  ;;  %v396_v15 = vmul.f32 %v393_v9, %v384_v13 }
  0xda   : > { %v386_v16 = vpop.f32.mrf.mxu0 }
  0xdb   : > { %v403_v17 = vmax.f32 %v401_v14, 0.0  ;;  %v402_v18 = vadd.f32 %v399_v11, %v396_v15 }
  0xdc   : > { %v387_v19 = vpop.f32.mrf.mxu0 }
  0xdd   : > { %v406_v20 = vpack.c.bf16 %v403_v17, %v403_v17  ;;  %v404_v21 = vmax.f32 %v402_v18, 0.0 }
  0xde   : > { %v512_v25 = vpop.f32.mrf.mxu0 }
  0xdf   : > { %v407_v22 = vpack.c.bf16 %v404_v21, %v404_v21  ;;  %v414_v23 = vsel %vm412_vm2, %v406_v20, 0 }
  0xe0   : > { %v514_v26 = vpop.f32.mrf.mxu0 }
  0xe1   : > { %650 = vmatprep.subr.msk.bf16.mxu1 %vm412_vm2, %v407_v22 }
  0xe2   : > { %434 = vmatpush1.bf16.msra.mxu1 %v414_v23  ;;  %v516_v27 = vpop.f32.mrf.mxu0 }
  0xe4   : > { %v517_v28 = vpop.f32.mrf.mxu0 }
  0xe5   : > { %651 = vmatmul.mubr.msk.bf16.vlgmr.msra.gmra.mxu1 %vm408_vm3, %v405_v24 }
 0x1a5   : > { %v453_v30 = vpop.f32.mrf.mxu1 }
 0x1a6   : > { %v466_v32 = vmul.f32 %v464_v29, %v453_v30 }
 0x1a7   : > { %v455_v33 = vpop.f32.mrf.mxu1 }
 0x1a8   : > { %v472_v34 = vadd.f32 %v470_v31, %v466_v32  ;;  %v467_v35 = vmul.f32 %v464_v29, %v455_v33 }
 0x1a9   : > { %v457_v36 = vpop.f32.mrf.mxu1 }
 0x1aa   : > { %v519_v37 = vadd.f32 %v512_v25, %v472_v34  ;;  %v473_v38 = vadd.f32 %v470_v31, %v467_v35 }
 0x1ab   : > { %v458_v39 = vpop.f32.mrf.mxu1 }
 0x1ac   : > { %v521_v40 = vmax.f32 %v519_v37, 0.0  ;;  %v520_v41 = vadd.f32 %v514_v26, %v473_v38 }
 0x1ae   : > { %523 = vst [vmem:[%s323_s25] sm:$0xff] %v521_v40  ;;  %v522_v42 = vmax.f32 %v520_v41, 0.0 }
 0x1b0   : > { %524 = vst [vmem:[%s323_s25 + $0x8] sm:$0xff] %v522_v42 }
 0x1b1 PF: > { %s16_s23 = sadd.s32 1, %s710_s23   ;;  %s809_s21 = smov %s706_s22 }
 0x1b2   : > { %p13_p5 = scmp.ge.s32.totalorder %s16_s23, 4   ;;  %s810_s22 = smov %s812_s24 }
 0x1b4   :  { %15 = sbr.rel (!%p13_p5) target bundleno = 2 (0x2), region = 80 }

</bundles_post_ra>
